<compile_context>
chip_gen: v7x
topology: tpu7x:2x2x1
jax: 0.10.0
libtpu: 0.0.40
codegen_flags: <defaults>
</compile_context>

<pallas_src>
import functools

import jax
import jax.numpy as jnp
from jax import lax
from jax.experimental import pallas as pl
from jax.experimental.pallas import tpu as pltpu


def _round_up(x, m):
    return ((x + m - 1) // m) * m


def _gnn_layer_kernel(x_ref, adj_ref, x0_ref, w_self_ref, wn_rowsum_ref,
                      o_ref, s_ref, *, n_nodes, col_block, mask_cols):
    """Grid = (row tiles [parallel], adjacency column tiles [arbitrary, innermost]).

    x_ref         : [TM, D_in]        node-feature row tile (compute dtype, resident over cols)
    adj_ref       : [TM, TN]          adjacency tile in its ORIGINAL narrow dtype
    x0_ref        : [1, TN]  f32      feature-0 of the TN source nodes of this column tile
    w_self_ref    : [D_out_pad, D_in] W_self (compute dtype, resident)
    wn_rowsum_ref : [1, D_out_pad] f32 row-sums of W_neigh, zero padded (resident)
    o_ref         : [TM, D_out_pad] f32
    s_ref         : [TM, 1] f32       scratch accumulator for the neighbour scalar
    """
    j = pl.program_id(1)

    @pl.when(j == 0)
    def _init():
        s_ref[...] = jnp.zeros_like(s_ref)

    # s[i] += sum_c adj[i, c] * x[c, 0].
    # The narrow adjacency is upcast to f32 in-register (VPU work hidden behind
    # the adjacency DMA, which is the real bottleneck; f32 math so v5e is fine).
    prod = adj_ref[...].astype(jnp.float32) * x0_ref[...]
    if mask_cols:
        # Ragged tail of the last column tile: OOB lanes hold garbage; mask them.
        col_ids = j * col_block + lax.broadcasted_iota(jnp.int32, (1, col_block), 1)
        prod = jnp.where(col_ids < n_nodes, prod, 0.0)
    s_ref[...] += jnp.sum(prod, axis=-1, keepdims=True)

    @pl.when(j == pl.num_programs(1) - 1)
    def _finalize():
        # Self term: x @ W_self.T as one MXU pass (contract D_in of both
        # operands directly on the nn.Linear layout -- no transpose copy).
        h = lax.dot_general(
            x_ref[...], w_self_ref[...],
            dimension_numbers=(((1,), (1,)), ((), ())),
            preferred_element_type=jnp.float32)
        # Neighbour term is rank-1: outer(s, rowsum(W_neigh)) -- pure VPU.
        h = h + s_ref[...] * wn_rowsum_ref[...]
        # act_fn = ReLU; lane-dense store (D_out padded to 128).
        o_ref[...] = jnp.maximum(h, 0.0).astype(o_ref.dtype)


def gnn_layer(node_feats, adj_matrix, w_self, w_neigh, *,
              block_rows=512, block_cols=2048,
              compute_dtype=jnp.bfloat16):
    """Pallas-TPU forward of GNNLayer (act_fn = ReLU).

    node_feats : [N, D_in] float
    adj_matrix : [N, N] binary {0,1}; any dtype (int8 / bf16 / f32) -- it is
                 streamed untouched in its original dtype and cast in-kernel.
    w_self, w_neigh : [D_out, D_in] nn.Linear weights (bias=False).
    """
    N, d_in = node_feats.shape
    d_out = w_self.shape[0]
    assert adj_matrix.shape == (N, N)
    assert w_neigh.shape == (d_out, d_in)

    # ---- row tiling (nodes): multiple of 8, clamped to the padded node count.
    tm = min(_round_up(max(block_rows, 1), 8), _round_up(N, 8))
    n_row_blocks = pl.cdiv(N, tm)
    n_row_pad = n_row_blocks * tm

    # ---- column tiling (adjacency reduction axis): multiple of 128 or full N.
    if N % 128 == 0:
        tn = min(_round_up(block_cols, 128), N)
    elif N <= block_cols:
        tn = N                                   # single full-width column block
    else:
        tn = _round_up(block_cols, 128)          # ragged tail masked in-kernel
    n_col_blocks = pl.cdiv(N, tn)
    mask_cols = (N % tn) != 0

    # ---- small operand prep (the NxN adjacency itself is passed through
    #      completely untouched -- no astype / pad copy of the big array).
    x = node_feats.astype(compute_dtype)
    if n_row_pad != N:
        x = jnp.pad(x, ((0, n_row_pad - N), (0, 0)))
    x0_row = node_feats[:, 0].astype(jnp.float32).reshape(1, N)

    d_out_pad = _round_up(d_out, 128)            # lane-dense output -> unmasked vst
    w_self_p = jnp.pad(w_self.astype(compute_dtype),
                       ((0, d_out_pad - d_out), (0, 0)))
    wn_rowsum = jnp.pad(jnp.sum(w_neigh.astype(jnp.float32), axis=1),
                        (0, d_out_pad - d_out)).reshape(1, d_out_pad)

    # ---- explicit VMEM budget (double-buffered streams + residents), capped
    #      below v7x's 64 MiB physical; generous floor for v5e/v6e.
    adj_itemsize = jnp.dtype(adj_matrix.dtype).itemsize
    c_itemsize = jnp.dtype(compute_dtype).itemsize
    vmem_est = (2 * tm * tn * adj_itemsize       # adjacency stream (dominant)
                + 2 * 1 * tn * 4                 # x0 column slices
                + 2 * tm * d_in * c_itemsize     # x row tile
                + 2 * tm * d_out_pad * 4         # output tile
                + d_out_pad * d_in * c_itemsize  # W_self (resident)
                + d_out_pad * 4                  # rowsum(W_neigh) (resident)
                + tm * 4)                        # scalar-accumulator scratch
    vmem_limit = int(min(48 * 1024 * 1024, max(24 * 1024 * 1024, 2 * vmem_est)))

    kernel = functools.partial(_gnn_layer_kernel, n_nodes=N,
                               col_block=tn, mask_cols=mask_cols)

    out = pl.pallas_call(
        kernel,
        out_shape=jax.ShapeDtypeStruct((n_row_pad, d_out_pad), jnp.float32),
        grid=(n_row_blocks, n_col_blocks),
        in_specs=[
            pl.BlockSpec((tm, d_in), lambda i, j: (i, 0)),         # x (resident over j)
            pl.BlockSpec((tm, tn), lambda i, j: (i, j)),           # adj (narrow stream)
            pl.BlockSpec((1, tn), lambda i, j: (0, j)),            # feature-0 row slice
            pl.BlockSpec((d_out_pad, d_in), lambda i, j: (0, 0)),  # W_self (resident)
            pl.BlockSpec((1, d_out_pad), lambda i, j: (0, 0)),     # rowsum(W_neigh)
        ],
        out_specs=pl.BlockSpec((tm, d_out_pad), lambda i, j: (i, 0)),
        scratch_shapes=[pltpu.VMEM((tm, 1), jnp.float32)],
        compiler_params=pltpu.CompilerParams(
            dimension_semantics=("parallel", "arbitrary"),
            vmem_limit_bytes=vmem_limit),
    )(x, adj_matrix, x0_row, w_self_p, wn_rowsum)

    return out[:N, :d_out]


def gnn_layer_ref(node_feats, adj_matrix, w_self, w_neigh):
    """Pure-JAX reference with the same (binary-adjacency) semantics."""
    x = node_feats.astype(jnp.float32)
    adj = adj_matrix.astype(jnp.float32)
    hp = lax.Precision.HIGHEST
    s = jnp.matmul(adj, x[:, 0], precision=hp)
    neigh = jnp.broadcast_to(s[:, None], x.shape)
    h = (jnp.matmul(x, w_self.T, precision=hp)
         + jnp.matmul(neigh, w_neigh.T, precision=hp))
    return jnp.maximum(h, 0.0)


if __name__ == "__main__":
    key = jax.random.PRNGKey(0)
    k_x, k_adj, k_ws, k_wn, k_x2, k_a2, k_x3, k_a3 = jax.random.split(key, 8)

    D_IN, D_OUT = 32, 32
    w_self = jax.random.normal(k_ws, (D_OUT, D_IN), dtype=jnp.float32) * 0.1
    w_neigh = jax.random.normal(k_wn, (D_OUT, D_IN), dtype=jnp.float32) * 0.1

    def make_graph(kx, ka, n, p):
        x = jax.random.normal(kx, (n, D_IN), dtype=jnp.float32)
        a = (jax.random.uniform(ka, (n, n)) > p)
        a = jnp.logical_and(a, ~jnp.eye(n, dtype=bool))
        return x, a

    # --- Test 1: small graph, int8 adjacency, default bf16 MXU inputs.
    x1, a1b = make_graph(k_x, k_adj, 8, 0.6)
    a1 = a1b.astype(jnp.int8)
    out1 = jax.block_until_ready(gnn_layer(x1, a1, w_self, w_neigh))
    ref1 = gnn_layer_ref(x1, a1, w_self, w_neigh)
    assert out1.shape == (8, D_OUT)
    assert jnp.allclose(out1, ref1, atol=3e-2, rtol=3e-2), "bf16 run mismatch"

    # Same graph with f32 MXU inputs -> tight tolerance.
    out1f = jax.block_until_ready(
        gnn_layer(x1, a1, w_self, w_neigh, compute_dtype=jnp.float32))
    assert jnp.allclose(out1f, ref1, atol=1e-4, rtol=1e-5), "f32 run mismatch"

    # --- Test 2: multi-row-block grid, f32 adjacency path, single column block.
    x2, a2b = make_graph(k_x2, k_a2, 40, 0.7)
    a2 = a2b.astype(jnp.float32)
    out2 = jax.block_until_ready(
        gnn_layer(x2, a2, w_self, w_neigh, block_rows=8,
                  compute_dtype=jnp.float32))
    ref2 = gnn_layer_ref(x2, a2, w_self, w_neigh)
    assert out2.shape == (40, D_OUT)
    assert jnp.allclose(out2, ref2, atol=1e-4, rtol=1e-5), "test2 mismatch"

    # --- Test 3: int8 adjacency, column tiling with a ragged tail
    #     (N=200, tn=128 -> masked last column tile) and a ragged last row tile.
    x3, a3b = make_graph(k_x3, k_a3, 200, 0.7)
    a3 = a3b.astype(jnp.int8)
    out3 = jax.block_until_ready(
        gnn_layer(x3, a3, w_self, w_neigh, block_rows=64, block_cols=128,
                  compute_dtype=jnp.float32))
    ref3 = gnn_layer_ref(x3, a3, w_self, w_neigh)
    assert out3.shape == (200, D_OUT)
    assert jnp.allclose(out3, ref3, atol=1e-4, rtol=1e-5), "test3 mismatch"

    print("KERNEL_OK")
</pallas_src>

<mosaic_0001>
module attributes {stable_mosaic.version = 11 : i64} {
  func.func @_gnn_layer_kernel(%arg0: i32, %arg1: i32, %arg2: memref<8x32xbf16, #tpu.memory_space<vmem>>, %arg3: memref<8x8xi8, #tpu.memory_space<vmem>>, %arg4: memref<1x8xf32, #tpu.memory_space<vmem>>, %arg5: memref<128x32xbf16, #tpu.memory_space<vmem>>, %arg6: memref<1x128xf32, #tpu.memory_space<vmem>>, %arg7: memref<8x128xf32, #tpu.memory_space<vmem>>, %arg8: memref<8x1xf32, #tpu.memory_space<vmem>>) attributes {dimension_semantics = [#tpu.dimension_semantics<parallel>, #tpu.dimension_semantics<arbitrary>], iteration_bounds = array<i64: 1, 1>, scalar_prefetch = 0 : i64, scratch_operands = 1 : i64, tpu.core_type = #tpu.core_type<tc>, window_params = [{transform_indices = @transform_0, window_bounds = array<i64: 8, 32>}, {transform_indices = @transform_1, window_bounds = array<i64: 8, 8>}, {transform_indices = @transform_2, window_bounds = array<i64: 1, 8>}, {pipeline_mode = #tpu.pipeline_mode<synchronous>, transform_indices = @transform_3, window_bounds = array<i64: 128, 32>}, {pipeline_mode = #tpu.pipeline_mode<synchronous>, transform_indices = @transform_4, window_bounds = array<i64: 1, 128>}, {transform_indices = @transform_5, window_bounds = array<i64: 8, 128>}]} {
    %c0_i32 = arith.constant 0 : i32
    %0 = arith.cmpi eq, %arg1, %c0_i32 : i32
    %1 = arith.extui %0 : i1 to i32
    %c0_i32_0 = arith.constant 0 : i32
    %2 = arith.cmpi ne, %1, %c0_i32_0 : i32
    scf.if %2 {
      %cst_10 = arith.constant 0.000000e+00 : f32
      %16 = vector.broadcast %cst_10 : f32 to vector<8x1xf32>
      %c0_11 = arith.constant 0 : index
      %c0_12 = arith.constant 0 : index
      %17 = vector.load %arg8[%c0_11, %c0_12] : memref<8x1xf32, #tpu.memory_space<vmem>>, vector<8x1xf32>
      tpu.vector_store %arg8[%c0_11, %c0_12], %16 {strides = array<i32>} : memref<8x1xf32, #tpu.memory_space<vmem>>, vector<8x1xf32>,
    } else {
    }
    %c0 = arith.constant 0 : index
    %c0_1 = arith.constant 0 : index
    %3 = vector.load %arg3[%c0, %c0_1] : memref<8x8xi8, #tpu.memory_space<vmem>>, vector<8x8xi8>
    %4 = arith.sitofp %3 : vector<8x8xi8> to vector<8x8xf32>
    %c0_2 = arith.constant 0 : index
    %c0_3 = arith.constant 0 : index
    %5 = vector.load %arg4[%c0_2, %c0_3] : memref<1x8xf32, #tpu.memory_space<vmem>>, vector<1x8xf32>
    %6 = vector.broadcast %5 : vector<1x8xf32> to vector<8x8xf32>
    %7 = arith.mulf %4, %6 : vector<8x8xf32>
    %c0_4 = arith.constant 0 : index
    %c0_5 = arith.constant 0 : index
    %8 = vector.load %arg8[%c0_4, %c0_5] : memref<8x1xf32, #tpu.memory_space<vmem>>, vector<8x1xf32>
    %cst = arith.constant dense<0.000000e+00> : vector<8xf32>
    %9 = vector.multi_reduction <add>, %7, %cst [1] : vector<8x8xf32> to vector<8xf32>
    %10 = vector.shape_cast %9 : vector<8xf32> to vector<8x1xf32>
    %11 = arith.addf %8, %10 : vector<8x1xf32>
    %c0_6 = arith.constant 0 : index
    %c0_7 = arith.constant 0 : index
    %12 = vector.load %arg8[%c0_6, %c0_7] : memref<8x1xf32, #tpu.memory_space<vmem>>, vector<8x1xf32>
    tpu.vector_store %arg8[%c0_6, %c0_7], %11 {strides = array<i32>} : memref<8x1xf32, #tpu.memory_space<vmem>>, vector<8x1xf32>,
    %c0_i32_8 = arith.constant 0 : i32
    %13 = arith.cmpi eq, %arg1, %c0_i32_8 : i32
    %14 = arith.extui %13 : i1 to i32
    %c0_i32_9 = arith.constant 0 : i32
    %15 = arith.cmpi ne, %14, %c0_i32_9 : i32
    scf.if %15 {
      %c0_10 = arith.constant 0 : index
      %c0_11 = arith.constant 0 : index
      %16 = vector.load %arg2[%c0_10, %c0_11] : memref<8x32xbf16, #tpu.memory_space<vmem>>, vector<8x32xbf16>
      %c0_12 = arith.constant 0 : index
      %c0_13 = arith.constant 0 : index
      %17 = vector.load %arg5[%c0_12, %c0_13] : memref<128x32xbf16, #tpu.memory_space<vmem>>, vector<128x32xbf16>
      %cst_14 = arith.constant dense<0.000000e+00> : vector<8x128xf32>
      %18 = tpu.matmul %16, %17, %cst_14 {dimension_numbers = #tpu.dot_dimension_numbers<[1], [1], [0], [0], [0, 0, 1, 0], [], []>} : vector<8x32xbf16>, vector<128x32xbf16>, vector<8x128xf32> -> vector<8x128xf32>
      %c0_15 = arith.constant 0 : index
      %c0_16 = arith.constant 0 : index
      %19 = vector.load %arg8[%c0_15, %c0_16] : memref<8x1xf32, #tpu.memory_space<vmem>>, vector<8x1xf32>
      %c0_17 = arith.constant 0 : index
      %c0_18 = arith.constant 0 : index
      %20 = vector.load %arg6[%c0_17, %c0_18] : memref<1x128xf32, #tpu.memory_space<vmem>>, vector<1x128xf32>
      %21 = vector.broadcast %19 : vector<8x1xf32> to vector<8x128xf32>
      %22 = vector.broadcast %20 : vector<1x128xf32> to vector<8x128xf32>
      %23 = arith.mulf %21, %22 : vector<8x128xf32>
      %24 = arith.addf %18, %23 : vector<8x128xf32>
      %cst_19 = arith.constant 0.000000e+00 : f32
      %25 = vector.broadcast %cst_19 : f32 to vector<8x128xf32>
      %26 = arith.maximumf %24, %25 : vector<8x128xf32>
      %c0_20 = arith.constant 0 : index
      %c0_21 = arith.constant 0 : index
      %27 = vector.load %arg7[%c0_20, %c0_21] : memref<8x128xf32, #tpu.memory_space<vmem>>, vector<8x128xf32>
      tpu.vector_store %arg7[%c0_20, %c0_21], %26 {strides = array<i32>} : memref<8x128xf32, #tpu.memory_space<vmem>>, vector<8x128xf32>,
    } else {
    }
    return
  }
  func.func @transform_0(%arg0: i32, %arg1: i32) -> (i32, i32) {
    %c0_i32 = arith.constant 0 : i32
    %c0_i32_0 = arith.constant 0 : i32
    return %arg0, %c0_i32 : i32, i32
  }
  func.func @transform_1(%arg0: i32, %arg1: i32) -> (i32, i32) {
    %c0_i32 = arith.constant 0 : i32
    return %arg0, %arg1 : i32, i32
  }
  func.func @transform_2(%arg0: i32, %arg1: i32) -> (i32, i32) {
    %c0_i32 = arith.constant 0 : i32
    %c0_i32_0 = arith.constant 0 : i32
    return %c0_i32, %arg1 : i32, i32
  }
  func.func @transform_3(%arg0: i32, %arg1: i32) -> (i32, i32) {
    %c0_i32 = arith.constant 0 : i32
    %c0_i32_0 = arith.constant 0 : i32
    %c0_i32_1 = arith.constant 0 : i32
    return %c0_i32, %c0_i32_0 : i32, i32
  }
  func.func @transform_4(%arg0: i32, %arg1: i32) -> (i32, i32) {
    %c0_i32 = arith.constant 0 : i32
    %c0_i32_0 = arith.constant 0 : i32
    %c0_i32_1 = arith.constant 0 : i32
    return %c0_i32, %c0_i32_0 : i32, i32
  }
  func.func @transform_5(%arg0: i32, %arg1: i32) -> (i32, i32) {
    %c0_i32 = arith.constant 0 : i32
    %c0_i32_0 = arith.constant 0 : i32
    return %arg0, %c0_i32 : i32, i32
  }
}

</mosaic_0001>

<bundles_post_ra>
// kernel: tpu_custom_call.1
= control target key start
LH: loop header
LB: loop body
LE: loop exit
PB: predicated region body
PF: predicated region fallthrough
CT: control target
= control target key end

     0   :  { %v282_v3 = vmov 0.0   ;;  %vm121_vm0 = vcmask 261120   ;;  %vm283_vm1 = vmmov 0   ;;  %vm40_vm2 = vcmask 64512   ;;  %s375_s0 = inlined_call_operand.vmem [shape: bf16[8,32], index: 0, kind: input, shape index: {}]   ;;  %s376_s1 = inlined_call_operand.vmem [shape: s8[8,8], index: 1, kind: input, shape index: {}]   ;;  %s377_s2 = inlined_call_operand.vmem [shape: f32[1,8], index: 2, kind: input, shape index: {}]   ;;  %s378_s3 = inlined_call_operand.vmem [shape: bf16[128,32], index: 3, kind: input, shape index: {}]   ;;  %s379_s4 = inlined_call_operand.vmem [shape: f32[1,128], index: 4, kind: input, shape index: {}]   ;;  %s380_s5 = inlined_call_operand.hbm [shape: f32[8,128], index: 5, kind: output, shape index: {}]  }
   0x1   :  { %v28_v0 = vld [vmem:[%s376_s1] sm:$0x3]  ;;  %225 = vmatprep.subr.bf16.mxu0 %v282_v3  ;;  %241 = vmatprep.mubr.msk.bf16.mxu0 %vm283_vm1, %v282_v3  ;;  %v251_v8 = vld [vmem:[%s378_s3 + $0x8] sm:$0xff]  }
   0x2   :  { %v205_v1 = vld [vmem:[%s377_s2] ss:$0 sm:$0xff]  ;;  %v29_v2 = vunpack.c.0.s8 %v28_v0  ;;  %v129_v10 = vsel %vm121_vm0, %v251_v8, 0 }
   0x3   :  { %v250_v4 = vld [vmem:[%s378_s3] sm:$0xff]  }
   0x4   :  { %v30_v5 = vcvt.s32.f32 %v29_v2  ;;  %v126_v6 = vsel %vm121_vm0, %v250_v4, 0 }
   0x5   :  { %226 = vmatpush3.bf16.xpose.msra.mxu0 %v126_v6 }
   0x6   :  { %v38_v7 = vmul.f32 %v205_v1, %v30_v5  ;;  %227 = vmatprep.subr.bf16.mxu0 %v282_v3 }
   0x8   :  { %v41_v9 = vsel %vm40_vm2, %v38_v7, 0.0 }
   0x9   :  { %42 = vadd.xlane.f32.xlu0 %v41_v9 }
   0xa   :  { %10 = vsyncpa [#allocation4], 0  ;;  %v252_v11 = vld [vmem:[%s378_s3 + $0x10] sm:$0xff]   ;;  %vm26_vm3 = vcmask 7168   ;;  %v253_v13 = vld [vmem:[%s378_s3 + $0x18] sm:$0xff]   ;;  %v284_v15 = vmov 0  }
   0xb   :  { %27 = vst.msk [vmem:[#allocation2] sm:$0xff] %vm26_vm3, %v282_v3  ;;  %v132_v12 = vsel %vm121_vm0, %v252_v11, 0  ;;  %v135_v14 = vsel %vm121_vm0, %v253_v13, 0  ;;  %249 = vset.pattern.permute.xlu0 %v284_v15  ;;  %v254_v16 = vld [vmem:[%s378_s3 + $0x20] sm:$0xff]   ;;  %v255_v18 = vld [vmem:[%s378_s3 + $0x28] sm:$0xff]   ;;  %v256_v20 = vld [vmem:[%s378_s3 + $0x30] sm:$0xff]  }
   0xc   :  { %v138_v17 = vsel %vm121_vm0, %v254_v16, 0  ;;  %v141_v19 = vsel %vm121_vm0, %v255_v18, 0  ;;  %v144_v21 = vsel %vm121_vm0, %v256_v20, 0  ;;  %v257_v22 = vld [vmem:[%s378_s3 + $0x38] sm:$0xff]   ;;  %v50_v24 = vld [vmem:[%s375_s0] sm:$0xf] }
   0xd   :  { %228 = vmatpush3.bf16.xpose.msra.mxu0 %v129_v10  ;;  %v147_v23 = vsel %vm121_vm0, %v257_v22, 0  ;;  %v206_v33 = vld [vmem:[%s379_s4] ss:$0 sm:$0xff]  ;;  %s285_s0 = smov [#allocation3]  }
   0xe   :  { %229 = vmatprep.subr.bf16.mxu0 %v282_v3  ;;  %s197_s14 = sshll.u32 %s285_s0, 4  ;;  %s198_s14 = int_to_ptr.vmem [resolvable:$true] %s197_s14 }
   0xf   :  { %s258_s15 = scalar_lea.vmem %s198_s14, 128  ;;  %p263_p1 = scmp.lt.s32.totalorder %s198_s14, %s198_s14 }
  0x10   :  { %p259_p0 = scmp.ne.s32.totalorder %s198_s14, %s258_s15  ;;  %p264_p2 = scmp.lt.s32.totalorder %s258_s15, %s258_s15 }
  0x12   :  { %v39_v25 = vld [vmem:[#allocation2] sm:$0xff]  ;;  %p265_p3 = por %p264_p2, %p263_p1 }
  0x14   :  { %p266_p4 = pnand %p265_p3, %p259_p0 }
  0x15   :  { %230 = vmatpush3.bf16.xpose.msra.mxu0 %v132_v12 }
  0x16   :  { %231 = vmatprep.subr.bf16.mxu0 %v282_v3 }
  0x1d   :  { %232 = vmatpush3.bf16.xpose.msra.mxu0 %v135_v14 }
  0x1e   :  { %233 = vmatprep.subr.bf16.mxu0 %v282_v3 }
  0x25   :  { %234 = vmatpush3.bf16.xpose.msra.mxu0 %v138_v17 }
  0x26   :  { %235 = vmatprep.subr.bf16.mxu0 %v282_v3 }
  0x2d   :  { %236 = vmatpush3.bf16.xpose.msra.mxu0 %v141_v19 }
  0x2e   :  { %237 = vmatprep.subr.bf16.mxu0 %v282_v3 }
  0x35   :  { %238 = vmatpush3.bf16.xpose.msra.mxu0 %v144_v21 }
  0x36   :  { %239 = vmatprep.subr.bf16.mxu0 %v282_v3 }
  0x3d   :  { %240 = vmatpush3.bf16.xpose.msra.mxu0 %v147_v23 }
  0x44   :  { %242 = vmatmul.mubr.msk.bf16.vlgmr.msra.gmra.mrb[0].mxu0 %vm121_vm0, %v50_v24 }
  0x96   :  { %v43_v26 = vpop.xlane.xlu0 %42 }
  0x97   :  { %v44_v27 = vadd.f32 %v43_v26, %v39_v25 }
  0x99   :  { %46 = vst.msk [vmem:[#allocation2] sm:$0xff] %vm26_vm3, %v44_v27 }
  0xa0   :  { %v67_v28 = vld [vmem:[#allocation2] sm:$0xff] }
  0xa1   :  { %71 = vperm.xlu0 %249, %v67_v28  }
 0x117   :  { %v183_v29 = vpop.f32.mrb[0].mxu0 }
 0x118   :  { %v243_v30 = vpop.f32.mrb[1].mxu0 }
 0x119   :  { %v186_v31 = vpop.f32.mrb[2].mxu0 }
 0x11a   :  { %v244_v32 = vpop.f32.mrb[3].mxu0 }
 0x120   :  { %v72_v34 = vpop.permute.xlu0 %71 }
 0x121   :  { %v80_v35 = vmul.f32 %v206_v33, %v72_v34 }
 0x123   :  { %v184_v36 = vadd.f32 %v183_v29, %v80_v35 }
 0x125   :  { %v189_v37 = vmax.f32 %v184_v36, 0.0 }
 0x127   :  { %190 = vst [vmem:[#allocation3] sm:$0xff] %v189_v37 }
 0x128   :  { %269 = shalt.err (!%p266_p4)
}
 0x129   :  { %s270_s18 = scalar_lea.hbm %s380_s5, 128 }
 0x12a   :  { %p271_p5 = scmp.ne.s32.totalorder %s380_s5, %s270_s18  ;;  %p274_p6 = scmp.lt.u32.totalorder %s270_s18, %s380_s5 }
 0x12c   :  { %p276_p7 = pnand %p274_p6, %p271_p5 }
 0x12e   :  { %279 = shalt.err (!%p276_p7)
}
 0x12f   :  { %200 = dma.vmem_to_hbm [thread:$0]  %s198_s14, 128, %s380_s5, [#allocation4]  }
 0x130   :  { %280 = dma.done.wait [#allocation4], 128  }
 0x131   :  { %281 = vsyncadd [#allocation4], 4294967168 }
 0x132   :  { %204 = vsyncpa [#allocation4], 1 }

</bundles_post_ra>
